<compile_context>
chip_gen: v7x
topology: tpu7x:2x2x1
jax: 0.10.0
libtpu: 0.0.40
codegen_flags: <defaults>
</compile_context>

<pallas_src>
import functools

import jax
import jax.numpy as jnp
from jax.experimental import pallas as pl
from jax.experimental.pallas import tpu as pltpu


def _round_up(n, m):
    return ((n + m - 1) // m) * m


def _coupling_kernel(reverse,
                     x_ref, m_ref,
                     w1_ref, b1_ref, w2_ref, b2_ref,
                     z_ref, ld_ref):
    # Transposed, lane-dense layout: features on sublanes, batch on lanes.
    x = x_ref[...]                     # (D, TB) f32
    m = m_ref[...]                     # (D, 1)  f32, binary
    inv_m = 1.0 - m
    D = x.shape[0]

    mx = x * m                         # masked_x

    # Fused first layer of both nets: (2H, D) @ (D, TB) -> (2H, TB)
    h = jnp.dot(w1_ref[...], mx, preferred_element_type=jnp.float32) + b1_ref[...]
    h = jnp.where(h > 0, h, 0.01 * h)  # LeakyReLU (torch default slope 0.01)

    # Fused (block-diagonal) second layer: (2D, 2H) @ (2H, TB) -> (2D, TB)
    o2 = jnp.dot(w2_ref[...], h, preferred_element_type=jnp.float32) + b2_ref[...]

    scale = jnp.tanh(o2[:D, :]) * inv_m     # (D, TB), already masked
    trans = o2[D:, :] * inv_m               # (D, TB), already masked

    if not reverse:
        # trans is already masked, so inv_m * trans == trans (binary mask).
        z = mx + inv_m * x * jnp.exp(scale) + trans
        ld = jnp.sum(scale, axis=0, keepdims=True)       # (1, TB), lane-dense
    else:
        z = mx + inv_m * (x - trans) * jnp.exp(-scale)
        ld = -jnp.sum(scale, axis=0, keepdims=True)

    z_ref[...] = z.astype(z_ref.dtype)
    ld_ref[...] = ld.astype(ld_ref.dtype)


def coupling_layer_forward(x, mask, params, reverse=False, tile_b=None):
    """x: (B, D) f32, mask: (D,) binary f32, params: dict. Returns (z, log_det)."""
    B, D = x.shape
    H = params["ws1"].shape[1]

    # ---- Fuse the two nets' weights once, in the wrapper (not per grid step) ----
    w1 = jnp.concatenate([params["ws1"], params["wt1"]], axis=1)          # (D, 2H)
    b1 = jnp.concatenate([params["bs1"], params["bt1"]], axis=1)          # (1, 2H)
    zero_hd = jnp.zeros((H, D), jnp.float32)
    w2 = jnp.concatenate(                                                  # (2H, 2D)
        [jnp.concatenate([params["ws2"], zero_hd], axis=1),
         jnp.concatenate([zero_hd, params["wt2"]], axis=1)], axis=0)
    b2 = jnp.concatenate([params["bs2"], params["bt2"]], axis=1)          # (1, 2D)

    # ---- Lane-dense layout: batch on lanes, padded to a multiple of the tile ----
    if tile_b is None:
        tile_b = min(1024, _round_up(B, 128))   # multiple of 128 lanes
    Bp = _round_up(B, tile_b)

    x_pad = jnp.pad(x.astype(jnp.float32), ((0, Bp - B), (0, 0)))
    xt = x_pad.T                                  # (D, Bp)
    m_col = mask.reshape(D, 1).astype(jnp.float32)
    w1_t = w1.T                                   # (2H, D)
    b1_col = b1.reshape(2 * H, 1)
    w2_t = w2.T                                   # (2D, 2H)
    b2_col = b2.reshape(2 * D, 1)

    grid = (pl.cdiv(Bp, tile_b),)
    kernel = functools.partial(_coupling_kernel, bool(reverse))

    flops = 2 * Bp * (D * 2 * H + 2 * H * 2 * D)
    bytes_accessed = 4 * (2 * D * Bp + Bp + D
                          + 2 * H * D + 2 * H * 2 * D + 2 * H + 2 * D)
    cost = pl.CostEstimate(flops=flops,
                           transcendentals=2 * D * Bp,
                           bytes_accessed=bytes_accessed)

    z_t, ld = pl.pallas_call(
        kernel,
        out_shape=(
            jax.ShapeDtypeStruct((D, Bp), jnp.float32),
            jax.ShapeDtypeStruct((1, Bp), jnp.float32),
        ),
        grid=grid,
        in_specs=[
            pl.BlockSpec((D, tile_b), lambda i: (0, i)),       # x (transposed)
            pl.BlockSpec((D, 1), lambda i: (0, 0)),            # mask column
            pl.BlockSpec((2 * H, D), lambda i: (0, 0)),        # fused W1^T (resident)
            pl.BlockSpec((2 * H, 1), lambda i: (0, 0)),        # fused b1
            pl.BlockSpec((2 * D, 2 * H), lambda i: (0, 0)),    # fused block-diag W2^T
            pl.BlockSpec((2 * D, 1), lambda i: (0, 0)),        # fused b2
        ],
        out_specs=(
            pl.BlockSpec((D, tile_b), lambda i: (0, i)),       # z (transposed)
            pl.BlockSpec((1, tile_b), lambda i: (0, i)),       # log_det (lane-dense)
        ),
        compiler_params=pltpu.CompilerParams(
            dimension_semantics=("parallel",),        # megacore sharding on v7x
            vmem_limit_bytes=32 * 1024 * 1024,        # explicit, safe on v5e/v6e/v7x
        ),
        cost_estimate=cost,
    )(xt, m_col, w1_t, b1_col, w2_t, b2_col)

    z = z_t[:, :B].T
    log_det = ld[0, :B]
    return z, log_det


def init_params(key, input_dim, hidden_dim):
    """Deterministic synthetic init (PyTorch-Linear-like uniform fan-in scaling)."""
    ks = jax.random.split(key, 8)

    def lin(kw, kb, fan_in, fan_out):
        bound = 1.0 / jnp.sqrt(fan_in)
        w = jax.random.uniform(kw, (fan_in, fan_out), jnp.float32, -bound, bound)
        b = jax.random.uniform(kb, (1, fan_out), jnp.float32, -bound, bound)
        return w, b

    ws1, bs1 = lin(ks[0], ks[1], input_dim, hidden_dim)
    ws2, bs2 = lin(ks[2], ks[3], hidden_dim, input_dim)
    wt1, bt1 = lin(ks[4], ks[5], input_dim, hidden_dim)
    wt2, bt2 = lin(ks[6], ks[7], hidden_dim, input_dim)
    return dict(ws1=ws1, bs1=bs1, ws2=ws2, bs2=bs2,
                wt1=wt1, bt1=bt1, wt2=wt2, bt2=bt2)


def _reference_forward(x, mask, p, reverse=False):
    """Pure-JAX reference mirroring the PyTorch module (unfused), for checking."""
    m = mask.reshape(1, -1)
    inv_m = 1.0 - m
    mx = x * m

    def leaky(h):
        return jnp.where(h > 0, h, 0.01 * h)

    scale = jnp.tanh(leaky(mx @ p["ws1"] + p["bs1"]) @ p["ws2"] + p["bs2"]) * inv_m
    trans = (leaky(mx @ p["wt1"] + p["bt1"]) @ p["wt2"] + p["bt2"]) * inv_m
    if not reverse:
        z = mx + inv_m * (x * jnp.exp(scale) + trans)
        ld = jnp.sum(scale * inv_m, axis=1)
    else:
        z = mx + inv_m * ((x - trans) * jnp.exp(-scale))
        ld = -jnp.sum(scale * inv_m, axis=1)
    return z, ld


if __name__ == "__main__":
    B, D, H = 8, 16, 32

    key = jax.random.PRNGKey(0)
    kx, kp = jax.random.split(key)

    x = jax.random.normal(kx, (B, D), jnp.float32)
    # alternating binary mask, as typical for coupling layers
    mask = (jnp.arange(D) % 2).astype(jnp.float32)
    params = init_params(kp, D, H)

    # forward direction
    z, log_det = coupling_layer_forward(x, mask, params, reverse=False)
    jax.block_until_ready((z, log_det))

    # reverse direction (also supported by the module)
    z_rev, log_det_rev = coupling_layer_forward(x, mask, params, reverse=True)
    jax.block_until_ready((z_rev, log_det_rev))

    # check against pure-JAX reference
    z_ref, ld_ref = _reference_forward(x, mask, params, reverse=False)
    zr_ref, ldr_ref = _reference_forward(x, mask, params, reverse=True)
    assert jnp.allclose(z, z_ref, atol=1e-5, rtol=1e-5)
    assert jnp.allclose(log_det, ld_ref, atol=1e-5, rtol=1e-5)
    assert jnp.allclose(z_rev, zr_ref, atol=1e-5, rtol=1e-5)
    assert jnp.allclose(log_det_rev, ldr_ref, atol=1e-5, rtol=1e-5)

    print("KERNEL_OK")
</pallas_src>

<mosaic_0001>
module attributes {stable_mosaic.version = 11 : i64} {
  func.func @_coupling_kernel(%arg0: i32, %arg1: memref<16x128xf32, #tpu.memory_space<vmem>>, %arg2: memref<16x1xf32, #tpu.memory_space<vmem>>, %arg3: memref<64x16xf32, #tpu.memory_space<vmem>>, %arg4: memref<64x1xf32, #tpu.memory_space<vmem>>, %arg5: memref<32x64xf32, #tpu.memory_space<vmem>>, %arg6: memref<32x1xf32, #tpu.memory_space<vmem>>, %arg7: memref<16x128xf32, #tpu.memory_space<vmem>>, %arg8: memref<1x128xf32, #tpu.memory_space<vmem>>) attributes {dimension_semantics = [#tpu.dimension_semantics<parallel>], iteration_bounds = array<i64: 1>, scalar_prefetch = 0 : i64, scratch_operands = 0 : i64, tpu.core_type = #tpu.core_type<tc>, window_params = [{transform_indices = @transform_0, window_bounds = array<i64: 16, 128>}, {pipeline_mode = #tpu.pipeline_mode<synchronous>, transform_indices = @transform_1, window_bounds = array<i64: 16, 1>}, {pipeline_mode = #tpu.pipeline_mode<synchronous>, transform_indices = @transform_2, window_bounds = array<i64: 64, 16>}, {pipeline_mode = #tpu.pipeline_mode<synchronous>, transform_indices = @transform_3, window_bounds = array<i64: 64, 1>}, {pipeline_mode = #tpu.pipeline_mode<synchronous>, transform_indices = @transform_4, window_bounds = array<i64: 32, 64>}, {pipeline_mode = #tpu.pipeline_mode<synchronous>, transform_indices = @transform_5, window_bounds = array<i64: 32, 1>}, {transform_indices = @transform_6, window_bounds = array<i64: 16, 128>}, {transform_indices = @transform_7, window_bounds = array<i64: 1, 128>}]} {
    %c0 = arith.constant 0 : index
    %c0_0 = arith.constant 0 : index
    %0 = vector.load %arg1[%c0, %c0_0] : memref<16x128xf32, #tpu.memory_space<vmem>>, vector<16x128xf32>
    %c0_1 = arith.constant 0 : index
    %c0_2 = arith.constant 0 : index
    %1 = vector.load %arg2[%c0_1, %c0_2] : memref<16x1xf32, #tpu.memory_space<vmem>>, vector<16x1xf32>
    %cst = arith.constant 1.000000e+00 : f32
    %2 = vector.broadcast %cst : f32 to vector<16x1xf32>
    %3 = arith.subf %2, %1 : vector<16x1xf32>
    %4 = vector.broadcast %1 : vector<16x1xf32> to vector<16x128xf32>
    %5 = arith.mulf %0, %4 : vector<16x128xf32>
    %c0_3 = arith.constant 0 : index
    %c0_4 = arith.constant 0 : index
    %6 = vector.load %arg3[%c0_3, %c0_4] : memref<64x16xf32, #tpu.memory_space<vmem>>, vector<64x16xf32>
    %cst_5 = arith.constant dense<0.000000e+00> : vector<64x128xf32>
    %7 = tpu.matmul %6, %5, %cst_5 {dimension_numbers = #tpu.dot_dimension_numbers<[1], [0], [0], [1], [0, 0, 1, 1], [], []>} : vector<64x16xf32>, vector<16x128xf32>, vector<64x128xf32> -> vector<64x128xf32>
    %c0_6 = arith.constant 0 : index
    %c0_7 = arith.constant 0 : index
    %8 = vector.load %arg4[%c0_6, %c0_7] : memref<64x1xf32, #tpu.memory_space<vmem>>, vector<64x1xf32>
    %9 = vector.broadcast %8 : vector<64x1xf32> to vector<64x128xf32>
    %10 = arith.addf %7, %9 : vector<64x128xf32>
    %cst_8 = arith.constant 0.000000e+00 : f32
    %11 = vector.broadcast %cst_8 : f32 to vector<64x128xf32>
    %12 = arith.cmpf ogt, %10, %11 : vector<64x128xf32>
    %cst_9 = arith.constant 0.00999999977 : f32
    %13 = vector.broadcast %cst_9 : f32 to vector<64x128xf32>
    %14 = arith.mulf %13, %10 : vector<64x128xf32>
    %15 = arith.select %12, %10, %14 : vector<64x128xi1>, vector<64x128xf32>
    %c0_10 = arith.constant 0 : index
    %c0_11 = arith.constant 0 : index
    %16 = vector.load %arg5[%c0_10, %c0_11] : memref<32x64xf32, #tpu.memory_space<vmem>>, vector<32x64xf32>
    %cst_12 = arith.constant dense<0.000000e+00> : vector<32x128xf32>
    %17 = tpu.matmul %16, %15, %cst_12 {dimension_numbers = #tpu.dot_dimension_numbers<[1], [0], [0], [1], [0, 0, 1, 1], [], []>} : vector<32x64xf32>, vector<64x128xf32>, vector<32x128xf32> -> vector<32x128xf32>
    %c0_13 = arith.constant 0 : index
    %c0_14 = arith.constant 0 : index
    %18 = vector.load %arg6[%c0_13, %c0_14] : memref<32x1xf32, #tpu.memory_space<vmem>>, vector<32x1xf32>
    %19 = vector.broadcast %18 : vector<32x1xf32> to vector<32x128xf32>
    %20 = arith.addf %17, %19 : vector<32x128xf32>
    %21 = vector.extract_strided_slice %20 {offsets = [0, 0], sizes = [16, 128], strides = [1, 1]} : vector<32x128xf32> to vector<16x128xf32>
    %22 = math.tanh %21 : vector<16x128xf32>
    %23 = vector.broadcast %3 : vector<16x1xf32> to vector<16x128xf32>
    %24 = arith.mulf %22, %23 : vector<16x128xf32>
    %25 = vector.extract_strided_slice %20 {offsets = [16, 0], sizes = [16, 128], strides = [1, 1]} : vector<32x128xf32> to vector<16x128xf32>
    %26 = vector.broadcast %3 : vector<16x1xf32> to vector<16x128xf32>
    %27 = arith.mulf %25, %26 : vector<16x128xf32>
    %28 = vector.broadcast %3 : vector<16x1xf32> to vector<16x128xf32>
    %29 = arith.mulf %28, %0 : vector<16x128xf32>
    %30 = math.exp %24 : vector<16x128xf32>
    %31 = arith.mulf %29, %30 : vector<16x128xf32>
    %32 = arith.addf %5, %31 : vector<16x128xf32>
    %33 = arith.addf %32, %27 : vector<16x128xf32>
    %cst_15 = arith.constant dense<0.000000e+00> : vector<128xf32>
    %34 = vector.multi_reduction <add>, %24, %cst_15 [0] : vector<16x128xf32> to vector<128xf32>
    %35 = vector.shape_cast %34 : vector<128xf32> to vector<1x128xf32>
    %c0_16 = arith.constant 0 : index
    %c0_17 = arith.constant 0 : index
    %36 = vector.load %arg7[%c0_16, %c0_17] : memref<16x128xf32, #tpu.memory_space<vmem>>, vector<16x128xf32>
    tpu.vector_store %arg7[%c0_16, %c0_17], %33 {strides = array<i32>} : memref<16x128xf32, #tpu.memory_space<vmem>>, vector<16x128xf32>,
    %c0_18 = arith.constant 0 : index
    %c0_19 = arith.constant 0 : index
    %37 = vector.load %arg8[%c0_18, %c0_19] : memref<1x128xf32, #tpu.memory_space<vmem>>, vector<1x128xf32>
    tpu.vector_store %arg8[%c0_18, %c0_19], %35 {strides = array<i32>} : memref<1x128xf32, #tpu.memory_space<vmem>>, vector<1x128xf32>,
    return
  }
  func.func @transform_0(%arg0: i32) -> (i32, i32) {
    %c0_i32 = arith.constant 0 : i32
    %c0_i32_0 = arith.constant 0 : i32
    return %c0_i32, %arg0 : i32, i32
  }
  func.func @transform_1(%arg0: i32) -> (i32, i32) {
    %c0_i32 = arith.constant 0 : i32
    %c0_i32_0 = arith.constant 0 : i32
    %c0_i32_1 = arith.constant 0 : i32
    return %c0_i32, %c0_i32_0 : i32, i32
  }
  func.func @transform_2(%arg0: i32) -> (i32, i32) {
    %c0_i32 = arith.constant 0 : i32
    %c0_i32_0 = arith.constant 0 : i32
    %c0_i32_1 = arith.constant 0 : i32
    return %c0_i32, %c0_i32_0 : i32, i32
  }
  func.func @transform_3(%arg0: i32) -> (i32, i32) {
    %c0_i32 = arith.constant 0 : i32
    %c0_i32_0 = arith.constant 0 : i32
    %c0_i32_1 = arith.constant 0 : i32
    return %c0_i32, %c0_i32_0 : i32, i32
  }
  func.func @transform_4(%arg0: i32) -> (i32, i32) {
    %c0_i32 = arith.constant 0 : i32
    %c0_i32_0 = arith.constant 0 : i32
    %c0_i32_1 = arith.constant 0 : i32
    return %c0_i32, %c0_i32_0 : i32, i32
  }
  func.func @transform_5(%arg0: i32) -> (i32, i32) {
    %c0_i32 = arith.constant 0 : i32
    %c0_i32_0 = arith.constant 0 : i32
    %c0_i32_1 = arith.constant 0 : i32
    return %c0_i32, %c0_i32_0 : i32, i32
  }
  func.func @transform_6(%arg0: i32) -> (i32, i32) {
    %c0_i32 = arith.constant 0 : i32
    %c0_i32_0 = arith.constant 0 : i32
    return %c0_i32, %arg0 : i32, i32
  }
  func.func @transform_7(%arg0: i32) -> (i32, i32) {
    %c0_i32 = arith.constant 0 : i32
    %c0_i32_0 = arith.constant 0 : i32
    return %c0_i32, %arg0 : i32, i32
  }
}

</mosaic_0001>

<bundles_post_ra>
// kernel: tpu_custom_call.1
= control target key start
LH: loop header
LB: loop body
LE: loop exit
PB: predicated region body
PF: predicated region fallthrough
CT: control target
= control target key end

     0   :  { %13 = vsyncpa [#allocation3], 0  ;;  %v604_v1 = vmov 0   ;;  %s785_s0 = inlined_call_operand.vmem [shape: f32[16,128], index: 0, kind: input, shape index: {}]   ;;  %s786_s1 = inlined_call_operand.vmem [shape: f32[16,1], index: 1, kind: input, shape index: {}]   ;;  %s787_s2 = inlined_call_operand.vmem [shape: f32[64,16], index: 2, kind: input, shape index: {}]   ;;  %s788_s3 = inlined_call_operand.vmem [shape: f32[64,1], index: 3, kind: input, shape index: {}]   ;;  %s789_s4 = inlined_call_operand.vmem [shape: f32[32,64], index: 4, kind: input, shape index: {}]   ;;  %s790_s5 = inlined_call_operand.vmem [shape: f32[32,1], index: 5, kind: input, shape index: {}]   ;;  %s791_s6 = inlined_call_operand.hbm [shape: f32[16,128], index: 6, kind: output, shape index: {0}]   ;;  %s792_s7 = inlined_call_operand.hbm [shape: f32[1,128], index: 7, kind: output, shape index: {1}]  }
   0x1   :  { %v29_v0 = vld [vmem:[%s786_s1] sm:$0xff]  ;;  %546 = vset.pattern.permute.xlu0 %v604_v1  ;;  %547 = vset.pattern.permute.xlu1 %v604_v1 }
   0x2   :  { %35 = vperm.xlu0 %546, %v29_v0  }
   0x3   :  { %14 = vsyncpa [#allocation5], 0  ;;  %v30_v2 = vld [vmem:[%s786_s1 + $0x8] sm:$0xff]  ;;  %v55_v3 = vld [vmem:[%s788_s3 + $0x10] sm:$0xff]  ;;  %vm101_vm0 = vcmask 130048   ;;  %v31_v8 = vsub.f32 1.0, %v29_v0 }
   0x4   :  { %v57_v4 = vld [vmem:[%s788_s3 + $0x20] sm:$0xff]  ;;  %v59_v6 = vld [vmem:[%s788_s3 + $0x30] sm:$0xff]  ;;  %v54_v11 = vld [vmem:[%s788_s3 + $0x8] sm:$0xff]  ;;  %v32_v16 = vsub.f32 1.0, %v30_v2  ;;  %vm283_vm1 = vcmask 523264   ;;  %s606_s29 = smov [#allocation2]  }
   0x5   :  { %v45_v5 = vld [vmem:[%s787_s2] sm:$0xff]  ;;  %v261_v9 = vld [vmem:[%s790_s5 + $0x10] sm:$0xff]  ;;  %v56_v12 = vld [vmem:[%s788_s3 + $0x18] sm:$0xff]  ;;  %s424_s30 = sshll.u32 %s606_s29, 4  ;;  %s425_s30 = int_to_ptr.vmem [resolvable:$true] %s424_s30 }
   0x6   :  { %40 = vperm.xlu0 %546, %v30_v2   ;;  %487 = vmatprep.mubr.msk.f32.mxu0 %vm101_vm0, %v45_v5  ;;  %v259_v7 = vld [vmem:[%s790_s5] sm:$0xff]  ;;  %v58_v13 = vld [vmem:[%s788_s3 + $0x28] sm:$0xff]  ;;  %v60_v14 = vld [vmem:[%s788_s3 + $0x38] sm:$0xff] }
   0x7   :  { %v53_v10 = vld [vmem:[%s788_s3] sm:$0xff]  ;;  %v260_v15 = vld [vmem:[%s790_s5 + $0x8] sm:$0xff]  ;;  %v262_v17 = vld [vmem:[%s790_s5 + $0x18] sm:$0xff] }
   0x8   :  { %63 = vperm.xlu1 %547, %v53_v10   ;;  %v698_v19 = vld [vmem:[%s785_s0] sm:$0xff]  ;;  %v703_v20 = vld [vmem:[%s785_s0 + $0x8] sm:$0xff]  ;;  %v47_v26 = vld [vmem:[%s787_s2 + $0x10] sm:$0xff] }
   0x9   :  { %v46_v25 = vld [vmem:[%s787_s2 + $0x8] sm:$0xff]  ;;  %v48_v27 = vld [vmem:[%s787_s2 + $0x18] sm:$0xff]  ;;  %v49_v28 = vld [vmem:[%s787_s2 + $0x20] sm:$0xff] }
   0xa   :  { %73 = vperm.xlu0 %546, %v55_v3   ;;  %v50_v29 = vld [vmem:[%s787_s2 + $0x28] sm:$0xff]  ;;  %v51_v30 = vld [vmem:[%s787_s2 + $0x30] sm:$0xff]  ;;  %v52_v31 = vld [vmem:[%s787_s2 + $0x38] sm:$0xff] }
   0xb   :  { %v255_v32 = vld [vmem:[%s789_s4] sm:$0xff] }
   0xc   :  { %68 = vperm.xlu1 %547, %v54_v11   ;;  %515 = vmatprep.mubr.msk.f32.mxu1 %vm283_vm1, %v255_v32 }
   0xe   :  { %83 = vperm.xlu0 %546, %v57_v4  }
  0x10   :  { %78 = vperm.xlu1 %547, %v56_v12  }
  0x12   :  { %93 = vperm.xlu0 %546, %v59_v6  }
  0x14   :  { %88 = vperm.xlu1 %547, %v58_v13   ;;  %v256_v13 = vld [vmem:[%s789_s4 + $0x8] sm:$0xff] }
  0x16   :  { %265 = vperm.xlu0 %546, %v259_v7  }
  0x18   :  { %98 = vperm.xlu1 %547, %v60_v14   ;;  %v257_v14 = vld [vmem:[%s789_s4 + $0x10] sm:$0xff] }
  0x1a   :  { %385 = vperm.xlu0 %546, %v31_v8  }
  0x1c   :  { %270 = vperm.xlu1 %547, %v260_v15   ;;  %v258_v15 = vld [vmem:[%s789_s4 + $0x18] sm:$0xff]  ;;  %s605_s4 = smov [#allocation4]  }
  0x1d   :  { %s437_s28 = sshll.u32 %s605_s4, 4  ;;  %s438_s28 = int_to_ptr.vmem [resolvable:$true] %s437_s28 }
  0x1e   :  { %275 = vperm.xlu0 %546, %v261_v9   ;;  %s556_s8 = scalar_lea.vmem %s438_s28, 16  ;;  %s560_s3 = scalar_lea.vmem %s438_s28, 32 }
  0x1f   :  { %p557_p0 = scmp.ne.s32.totalorder %s438_s28, %s556_s8  ;;  %p561_p1 = scmp.lt.s32.totalorder %s438_s28, %s438_s28 }
  0x20   :  { %390 = vperm.xlu1 %547, %v32_v16   ;;  %p562_p2 = scmp.lt.s32.totalorder %s560_s3, %s556_s8 }
  0x22   :  { %p563_p3 = por %p562_p2, %p561_p1 }
  0x24   :  { %280 = vperm.xlu1 %547, %v262_v17   ;;  %p564_p4 = pnand %p563_p3, %p557_p0 }
  0x81   :  { %v36_v18 = vpop.permute.xlu0 %35 }
  0x82   :  { %v706_v22 = vmul.f32 %v36_v18, %v698_v19 }
  0x85   :  { %v41_v21 = vpop.permute.xlu0 %40 }
  0x86   :  { %v709_v23 = vmul.f32 %v41_v21, %v703_v20 }
  0x87   :  { %v64_v33 = vpop.permute.xlu1 %63 }
  0x88   :  { %v521_v24 = vpack.c.bf16 %v709_v23, %v706_v22 }
  0x89   :  { %v74_v37 = vpop.permute.xlu0 %73 }
  0x8a   :  { %522 = vmatprep.subr.bf16.mxu0 %v521_v24 }
  0x8b   :  { %524 = vmatpush3.bf16.msra.mxu0 %v521_v24  ;;  %v69_v34 = vpop.permute.xlu1 %68 }
  0x8d   :  { %v84_v50 = vpop.permute.xlu0 %83 }
  0x8e   :  { %488 = vmatmul.mubr.msk.f32.vlgmr.msra.gmra.mrb[0].mxu0 %vm101_vm0, %v46_v25 }
  0x8f   :  { %490 = vmatprep.mubr.msk.f32.mxu0 %vm101_vm0, %v47_v26  ;;  %v79_v35 = vpop.permute.xlu1 %78 }
  0x91   :  { %v94_v1 = vpop.permute.xlu0 %93 }
  0x92   :  { %491 = vmatmul.mubr.msk.f32.gmra.mrb[2].mxu0 %vm101_vm0, %v48_v27 }
  0x93   :  { %493 = vmatprep.mubr.msk.f32.mxu0 %vm101_vm0, %v49_v28  ;;  %v89_v47 = vpop.permute.xlu1 %88 }
  0x95   :  { %v266_v18 = vpop.permute.xlu0 %265 }
  0x96   :  { %494 = vmatmul.mubr.msk.f32.gmra.mrb[4].mxu0 %vm101_vm0, %v50_v29 }
  0x97   :  { %496 = vmatprep.mubr.msk.f32.mxu0 %vm101_vm0, %v51_v30  ;;  %v99_v62 = vpop.permute.xlu1 %98 }
  0x9a   :  { %497 = vmatmul.mubr.msk.f32.gmra.mrb[6].mxu0 %vm101_vm0, %v52_v31  ;;  %v386_v31 = vpop.permute.xlu0 %385 }
  0x9b   :  { %v271_v16 = vpop.permute.xlu1 %270 }
  0x9f   :  { %v391_v29 = vpop.permute.xlu1 %390 }
 0x161   :  { %v489_v36 = vpop.f32.mrb[0].mxu0 }
 0x162   :  { %v198_v38 = vadd.f32 %v489_v36, %v69_v34  ;;  %v192_v39 = vpop.f32.mrb[1].mxu0 }
 0x163   :  { %v193_v40 = vadd.f32 %v192_v39, %v64_v33 }
 0x164   :  { %v240_v41 = vmul.f32 0.01, %v198_v38  ;;  %vm232_vm2 = vcmp.gt.f32.partialorder %v198_v38, 0.0 }
 0x165   :  { %v239_v42 = vmul.f32 0.01, %v193_v40  ;;  %v492_v43 = vpop.f32.mrb[2].mxu0  ;;  %vm231_vm3 = vcmp.gt.f32.partialorder %v193_v40, 0.0 }
 0x166   :  { %v208_v44 = vadd.f32 %v492_v43, %v79_v35  ;;  %v202_v45 = vpop.f32.mrb[3].mxu0  ;;  %v248_v46 = vsel %vm232_vm2, %v198_v38, %v240_v41  ;;  %v281_v41 = vpop.permute.xlu1 %280  ;;  %v398_v43 = vmul.f32 %v391_v29, %v703_v20 }
 0x167   :  { %v203_v48 = vadd.f32 %v202_v45, %v74_v37  ;;  %v247_v49 = vsel %vm231_vm3, %v193_v40, %v239_v42  ;;  %v276_v42 = vpop.permute.xlu0 %275 }
 0x168   :  { %vm234_vm4 = vcmp.gt.f32.partialorder %v208_v44, 0.0  ;;  %v242_v51 = vmul.f32 0.01, %v208_v44  ;;  %v525_v52 = vpack.c.bf16 %v248_v46, %v247_v49 }
 0x169   :  { %vm233_vm5 = vcmp.gt.f32.partialorder %v203_v48, 0.0  ;;  %v241_v53 = vmul.f32 0.01, %v203_v48  ;;  %v495_v54 = vpop.f32.mrb[4].mxu0 }
 0x16a   :  { %v218_v55 = vadd.f32 %v495_v54, %v89_v47  ;;  %v212_v56 = vpop.f32.mrb[5].mxu0  ;;  %526 = vmatprep.subr.bf16.mxu1 %v525_v52  ;;  %v250_v57 = vsel %vm234_vm4, %v208_v44, %v242_v51  ;;  %v397_v47 = vmul.f32 %v386_v31, %v698_v19 }
 0x16b   :  { %v213_v58 = vadd.f32 %v212_v56, %v84_v50  ;;  %528 = vmatpush3.bf16.msra.mxu1 %v525_v52  ;;  %v249_v59 = vsel %vm233_vm5, %v203_v48, %v241_v53 }
 0x16c   :  { %vm236_vm6 = vcmp.gt.f32.partialorder %v218_v55, 0.0  ;;  %v244_v60 = vmul.f32 0.01, %v218_v55  ;;  %v529_v61 = vpack.c.bf16 %v250_v57, %v249_v59 }
 0x16d   :  { %vm235_vm7 = vcmp.gt.f32.partialorder %v213_v58, 0.0  ;;  %v243_v63 = vmul.f32 0.01, %v213_v58  ;;  %v498_v0 = vpop.f32.mrb[6].mxu0 }
 0x16e   :  { %v228_v2 = vadd.f32 %v498_v0, %v99_v62  ;;  %v222_v3 = vpop.f32.mrb[7].mxu0  ;;  %530 = vmatprep.subr.bf16.mxu1 %v529_v61  ;;  %v252_v4 = vsel %vm236_vm6, %v218_v55, %v244_v60 }
 0x16f   :  { %v223_v5 = vadd.f32 %v222_v3, %v94_v1  ;;  %532 = vmatpush3.bf16.msra.mxu1 %v529_v61  ;;  %v251_v6 = vsel %vm235_vm7, %v213_v58, %v243_v63 }
 0x170   :  { %vm238_vm8 = vcmp.gt.f32.partialorder %v228_v2, 0.0  ;;  %v246_v7 = vmul.f32 0.01, %v228_v2  ;;  %v533_v8 = vpack.c.bf16 %v252_v4, %v251_v6 }
 0x171   :  { %vm237_vm9 = vcmp.gt.f32.partialorder %v223_v5, 0.0  ;;  %v245_v9 = vmul.f32 0.01, %v223_v5 }
 0x172   :  { %534 = vmatprep.subr.bf16.mxu1 %v533_v8  ;;  %v254_v10 = vsel %vm238_vm8, %v228_v2, %v246_v7 }
 0x173   :  { %536 = vmatpush3.bf16.msra.mxu1 %v533_v8  ;;  %v253_v11 = vsel %vm237_vm9, %v223_v5, %v245_v9 }
 0x174   :  { %v537_v12 = vpack.c.bf16 %v254_v10, %v253_v11 }
 0x176   :  { %538 = vmatprep.subr.bf16.mxu1 %v537_v12 }
 0x177   :  { %540 = vmatpush3.bf16.msra.mxu1 %v537_v12 }
 0x17a   :  { %516 = vmatmul.mubr.msk.f32.vlgmr.msra.gmra.mrb[0].mxu1 %vm283_vm1, %v256_v13 }
 0x17b   :  { %518 = vmatprep.mubr.msk.f32.mxu1 %vm283_vm1, %v257_v14 }
 0x17e   :  { %519 = vmatmul.mubr.msk.f32.gmra.mrb[2].mxu1 %vm283_vm1, %v258_v15 }
 0x24d   :  { %v517_v17 = vpop.f32.mrb[0].mxu1 }
 0x24e   :  { %v368_v21 = vadd.f32 %v517_v17, %v271_v16  ;;  %v362_v24 = vpop.f32.mrb[1].mxu1 }
 0x24f   :  { %v363_v25 = vadd.f32 %v362_v24, %v266_v18 }
 0x250   :  { %548 = vtanh.f32 %v368_v21 }
 0x251   :  { %550 = vtanh.f32 %v363_v25  ;;  %v520_v26 = vpop.f32.mrb[2].mxu1 }
 0x252   :  { %v372_v27 = vpop.f32.mrb[3].mxu1  ;;  %v378_v44 = vadd.f32 %v520_v26, %v281_v41 }
 0x253   :  { %v373_v48 = vadd.f32 %v372_v27, %v276_v42 }
 0x254   :  { %v396_v53 = vmul.f32 %v391_v29, %v378_v44 }
 0x255   :  { %v395_v55 = vmul.f32 %v386_v31, %v373_v48 }
 0x25a   :  { %v549_v28 = vpop.eup %548 }
 0x25b   :  { %v551_v30 = vpop.eup %550  ;;  %v394_v32 = vmul.f32 %v549_v28, %v391_v29 }
 0x25c   :  { %v393_v33 = vmul.f32 %v551_v30, %v386_v31 }
 0x25d   :  { %v401_v34 = vmul.f32 1.442695, %v394_v32 }
 0x25e   :  { %v399_v35 = vmul.f32 1.442695, %v393_v33  ;;  %v409_v36 = vadd.f32 %v394_v32, %v393_v33 }
 0x25f   :  { %552 = vpow2.f32 %v401_v34 }
 0x260   :  { %554 = vpow2.f32 %v399_v35  ;;  %v410_v37 = vrot.slane %v409_v36, 4 }
 0x262   :  { %v411_v38 = vadd.f32 %v410_v37, %v409_v36 }
 0x264   :  { %v412_v39 = vrot.slane %v411_v38, 2 }
 0x266   :  { %v413_v40 = vadd.f32 %v412_v39, %v411_v38 }
 0x268   :  { %v414_v45 = vrot.slane %v413_v40, 1 }
 0x269   :  { %v553_v46 = vpop.eup %552 }
 0x26a   :  { %v555_v49 = vpop.eup %554  ;;  %v404_v50 = vmul.f32 %v553_v46, %v398_v43  ;;  %v415_v51 = vadd.f32 %v414_v45, %v413_v40 }
 0x26b   :  { %v403_v52 = vmul.f32 %v555_v49, %v397_v47 }
 0x26c   :  { %v406_v54 = vadd.f32 %v404_v50, %v709_v23  ;;  %418 = vst [vmem:[#allocation4] sm:$0x1] %v415_v51 }
 0x26d   :  { %v405_v20 = vadd.f32 %v403_v52, %v706_v22 }
 0x26e   :  { %567 = shalt.err (!%p564_p4)
}
 0x26f   :  { %s568_s10 = scalar_lea.hbm %s792_s7, 16 }
 0x270   :  { %p569_p5 = scmp.ne.s32.totalorder %s792_s7, %s568_s10  ;;  %p572_p6 = scmp.lt.u32.totalorder %s568_s10, %s792_s7 }
 0x272   :  { %p574_p7 = pnand %p572_p6, %p569_p5 }
 0x274   :  { %577 = shalt.err (!%p574_p7)
}
 0x275   :  { %440 = dma.vmem_to_hbm [thread:$0]  %s438_s28, 16, %s792_s7, [#allocation5]   ;;  %v408_v19 = vadd.f32 %v406_v54, %v396_v53  ;;  %v407_v22 = vadd.f32 %v405_v20, %v395_v55 }
 0x276   :  { %s578_s15 = scalar_lea.vmem %s425_s30, 256  ;;  %p583_p9 = scmp.lt.s32.totalorder %s425_s30, %s425_s30 }
 0x277   :  { %417 = vst [vmem:[#allocation2 + $0x8] sm:$0xff] %v408_v19  ;;  %416 = vst [vmem:[#allocation2] sm:$0xff] %v407_v22  ;;  %p579_p8 = scmp.ne.s32.totalorder %s425_s30, %s578_s15  ;;  %p584_p10 = scmp.lt.s32.totalorder %s578_s15, %s578_s15 }
 0x279   :  { %p585_p11 = por %p584_p10, %p583_p9 }
 0x27b   :  { %p586_p12 = pnand %p585_p11, %p579_p8 }
 0x27d   :  { %589 = shalt.err (!%p586_p12)
}
 0x27e   :  { %s590_s18 = scalar_lea.hbm %s791_s6, 256 }
 0x27f   :  { %p591_p13 = scmp.ne.s32.totalorder %s791_s6, %s590_s18  ;;  %p594_p0 = scmp.lt.u32.totalorder %s590_s18, %s791_s6 }
 0x281   :  { %p596_p1 = pnand %p594_p0, %p591_p13 }
 0x283   :  { %599 = shalt.err (!%p596_p1)
}
 0x284   :  { %s607_s22 = smov 128   ;;  %s608_s2 = smov 8  }
 0x285   :  { %430 = dma.vmem_to_hbm [thread:$0]  %s425_s30, 256, %s791_s6, [#allocation3], %s607_s22, %s607_s22, %s608_s2  }
 0x286   :  { %600 = dma.done.wait [#allocation3], 256  }
 0x287   :  { %601 = vsyncadd [#allocation3], 4294967040 }
 0x288   :  { %602 = dma.done.wait [#allocation5], 16  }
 0x289   :  { %603 = vsyncadd [#allocation5], 4294967280 }
 0x28a   :  { %447 = vsyncpa [#allocation3], 1 }
 0x28b   :  { %448 = vsyncpa [#allocation5], 1 }

</bundles_post_ra>
